<compile_context>
chip_gen: v7x
topology: tpu7x:2x2x1
jax: 0.10.0
libtpu: 0.0.40
codegen_flags: <defaults>
</compile_context>

<pallas_src>
import functools

import jax
import jax.numpy as jnp
from jax.experimental import pallas as pl
from jax.experimental.pallas import tpu as pltpu

DROPOUT_P = 0.2
EMBED_DIM = 128

_KEEP_THRESHOLD = int(DROPOUT_P * (1 << 32))   # u32 hash >= threshold  <=>  keep (p_keep = 0.8)
_KEEP_SCALE = 1.0 / (1.0 - DROPOUT_P)
_MAX_TM = 1024                                 # 512-1024 row tiles sit near the HBM roofline


def _round_up(n, m):
    return ((n + m - 1) // m) * m


def _dropout_keep_mask(shape, seed_u32, tile_rows):
    """Stateless per-element hash PRNG -> boolean keep-mask (pure uint32 VPU ops)."""
    tm, d = shape
    row = jax.lax.broadcasted_iota(jnp.int32, shape, 0).astype(jnp.uint32)
    col = jax.lax.broadcasted_iota(jnp.int32, shape, 1).astype(jnp.uint32)
    base = pl.program_id(0).astype(jnp.uint32) * jnp.uint32(tile_rows)
    idx = (base + row) * jnp.uint32(d) + col
    z = idx ^ seed_u32
    z = z * jnp.uint32(0x9E3779B1)
    z = z ^ (z >> 15)
    z = z * jnp.uint32(0x85EBCA77)
    z = z ^ (z >> 13)
    z = z * jnp.uint32(0xC2B2AE3D)
    z = z ^ (z >> 16)
    return z >= jnp.uint32(_KEEP_THRESHOLD)


def _ff_body(x_ref, w1_ref, b1_ref, w2_ref, b2_ref):
    # Linear 1 + ReLU (MXU matmul, f32 accumulate), then Linear 2.
    h = jnp.dot(x_ref[...], w1_ref[...], preferred_element_type=jnp.float32) + b1_ref[...]
    h = jnp.maximum(h, 0.0)
    return jnp.dot(h, w2_ref[...], preferred_element_type=jnp.float32) + b2_ref[...]


def _ff_train_kernel(seed_ref, x_ref, w1_ref, b1_ref, w2_ref, b2_ref, o_ref):
    # x_ref: (TM, D)  w1_ref: (D, 4D)  b1_ref: (1, 4D)  w2_ref: (4D, D)  b2_ref: (1, D)
    y = _ff_body(x_ref, w1_ref, b1_ref, w2_ref, b2_ref)
    # Inverted dropout (training-mode semantics), deterministic seed.
    # TODO(synk): torch uses its own RNG stream; mask values won't match torch bit-for-bit.
    keep = _dropout_keep_mask(y.shape, seed_ref[0].astype(jnp.uint32), y.shape[0])
    y = jnp.where(keep, y * _KEEP_SCALE, 0.0)
    o_ref[...] = y.astype(o_ref.dtype)


def _ff_eval_kernel(seed_ref, x_ref, w1_ref, b1_ref, w2_ref, b2_ref, o_ref):
    # Eval-mode (dropout = identity), used for correctness checking.
    del seed_ref
    o_ref[...] = _ff_body(x_ref, w1_ref, b1_ref, w2_ref, b2_ref).astype(o_ref.dtype)


@functools.partial(jax.jit, static_argnames=("training",))
def feed_forward(x, w1, b1, w2, b2, seed, training=True):
    """x: [..., D] float32. Returns same shape."""
    orig_shape = x.shape
    D = orig_shape[-1]
    M = x.size // D
    x2d = x.reshape(M, D)
    H = w1.shape[1]  # 4 * D

    # Row tiling: TM multiple of 8 (f32 sublane), pad M up to a multiple of TM.
    m8 = max(_round_up(M, 8), 8)
    TM = min(_MAX_TM, m8)
    M_pad = _round_up(m8, TM)
    if M_pad != M:
        x2d = jnp.pad(x2d, ((0, M_pad - M), (0, 0)))
    num_tiles = M_pad // TM

    kernel = _ff_train_kernel if training else _ff_eval_kernel

    grid_spec = pltpu.PrefetchScalarGridSpec(
        num_scalar_prefetch=1,                 # seed lands in SMEM
        grid=(num_tiles,),
        in_specs=[
            pl.BlockSpec((TM, D), lambda i, seed_ref: (i, 0)),  # x: row-tiled (streamed)
            pl.BlockSpec((D, H), lambda i, seed_ref: (0, 0)),   # w1: resident
            pl.BlockSpec((1, H), lambda i, seed_ref: (0, 0)),   # b1: resident
            pl.BlockSpec((H, D), lambda i, seed_ref: (0, 0)),   # w2: resident
            pl.BlockSpec((1, D), lambda i, seed_ref: (0, 0)),   # b2: resident
        ],
        out_specs=pl.BlockSpec((TM, D), lambda i, seed_ref: (i, 0)),
    )

    cost = pl.CostEstimate(
        flops=2 * M_pad * (D * H + H * D),
        transcendentals=0,
        bytes_accessed=4 * (2 * M_pad * D + D * H + H * D + H + D),
    )

    out = pl.pallas_call(
        kernel,
        out_shape=jax.ShapeDtypeStruct((M_pad, D), jnp.float32),
        grid_spec=grid_spec,
        compiler_params=pltpu.CompilerParams(
            dimension_semantics=("parallel",),   # v7x: shard row tiles across both TensorCores
            vmem_limit_bytes=32 << 20,           # actual need ~7 MiB @ TM=1024; headroom on v7x
        ),
        cost_estimate=cost,
    )(seed, x2d, w1, b1, w2, b2)

    if M_pad != M:
        out = out[:M]
    return out.reshape(orig_shape)


def init_params(key, embed_dim):
    """Deterministic init mimicking torch.nn.Linear defaults (U(-1/sqrt(fan_in), +))."""
    k1, k2, k3, k4 = jax.random.split(key, 4)
    hidden = 4 * embed_dim
    bound1 = 1.0 / (embed_dim ** 0.5)
    bound2 = 1.0 / (hidden ** 0.5)
    w1 = jax.random.uniform(k1, (embed_dim, hidden), jnp.float32, -bound1, bound1)
    b1 = jax.random.uniform(k2, (1, hidden), jnp.float32, -bound1, bound1)
    w2 = jax.random.uniform(k3, (hidden, embed_dim), jnp.float32, -bound2, bound2)
    b2 = jax.random.uniform(k4, (1, embed_dim), jnp.float32, -bound2, bound2)
    return w1, b1, w2, b2


if __name__ == "__main__":
    key = jax.random.PRNGKey(0)
    kx, kp = jax.random.split(key)

    batch, seq, D = 2, 8, EMBED_DIM
    x = jax.random.normal(kx, (batch, seq, D), jnp.float32)
    w1, b1, w2, b2 = init_params(kp, D)
    seed = jnp.array([1234], dtype=jnp.int32)

    # Training-mode forward (with in-kernel dropout).
    y_train = feed_forward(x, w1, b1, w2, b2, seed, training=True)
    jax.block_until_ready(y_train)

    # Eval-mode forward, checked against a pure-JAX reference.
    y_eval = feed_forward(x, w1, b1, w2, b2, seed, training=False)
    jax.block_until_ready(y_eval)

    ref = jnp.maximum(x @ w1 + b1, 0.0) @ w2 + b2
    assert y_train.shape == x.shape and y_eval.shape == x.shape
    assert jnp.allclose(y_eval, ref, atol=1e-4, rtol=1e-4)

    # Loose sanity check that dropout actually dropped ~20% of elements.
    zero_frac = float(jnp.mean(y_train == 0.0))
    assert 0.05 < zero_frac < 0.5, f"unexpected dropout zero fraction {zero_frac}"

    print("KERNEL_OK")
</pallas_src>

<mosaic_0001>
module attributes {stable_mosaic.version = 11 : i64} {
  func.func @_ff_train_kernel(%arg0: i32, %arg1: memref<1xi32, #tpu.memory_space<smem>>, %arg2: memref<16x128xf32, #tpu.memory_space<vmem>>, %arg3: memref<128x512xf32, #tpu.memory_space<vmem>>, %arg4: memref<1x512xf32, #tpu.memory_space<vmem>>, %arg5: memref<512x128xf32, #tpu.memory_space<vmem>>, %arg6: memref<1x128xf32, #tpu.memory_space<vmem>>, %arg7: memref<16x128xf32, #tpu.memory_space<vmem>>) attributes {dimension_semantics = [#tpu.dimension_semantics<parallel>], iteration_bounds = array<i64: 1>, scalar_prefetch = 1 : i64, scratch_operands = 0 : i64, tpu.core_type = #tpu.core_type<tc>, window_params = [{transform_indices = @transform_0, window_bounds = array<i64: 16, 128>}, {pipeline_mode = #tpu.pipeline_mode<synchronous>, transform_indices = @transform_1, window_bounds = array<i64: 128, 512>}, {pipeline_mode = #tpu.pipeline_mode<synchronous>, transform_indices = @transform_2, window_bounds = array<i64: 1, 512>}, {pipeline_mode = #tpu.pipeline_mode<synchronous>, transform_indices = @transform_3, window_bounds = array<i64: 512, 128>}, {pipeline_mode = #tpu.pipeline_mode<synchronous>, transform_indices = @transform_4, window_bounds = array<i64: 1, 128>}, {transform_indices = @transform_5, window_bounds = array<i64: 16, 128>}]} {
    %c0 = arith.constant 0 : index
    %c0_0 = arith.constant 0 : index
    %0 = vector.load %arg2[%c0, %c0_0] : memref<16x128xf32, #tpu.memory_space<vmem>>, vector<16x128xf32>
    %c0_1 = arith.constant 0 : index
    %c0_2 = arith.constant 0 : index
    %1 = vector.load %arg3[%c0_1, %c0_2] : memref<128x512xf32, #tpu.memory_space<vmem>>, vector<128x512xf32>
    %cst = arith.constant dense<0.000000e+00> : vector<16x512xf32>
    %2 = tpu.matmul %0, %1, %cst {dimension_numbers = #tpu.dot_dimension_numbers<[1], [0], [0], [1], [0, 0, 1, 1], [], []>} : vector<16x128xf32>, vector<128x512xf32>, vector<16x512xf32> -> vector<16x512xf32>
    %c0_3 = arith.constant 0 : index
    %c0_4 = arith.constant 0 : index
    %3 = vector.load %arg4[%c0_3, %c0_4] : memref<1x512xf32, #tpu.memory_space<vmem>>, vector<1x512xf32>
    %4 = vector.broadcast %3 : vector<1x512xf32> to vector<16x512xf32>
    %5 = arith.addf %2, %4 : vector<16x512xf32>
    %cst_5 = arith.constant 0.000000e+00 : f32
    %6 = vector.broadcast %cst_5 : f32 to vector<16x512xf32>
    %7 = arith.maximumf %5, %6 : vector<16x512xf32>
    %c0_6 = arith.constant 0 : index
    %c0_7 = arith.constant 0 : index
    %8 = vector.load %arg5[%c0_6, %c0_7] : memref<512x128xf32, #tpu.memory_space<vmem>>, vector<512x128xf32>
    %cst_8 = arith.constant dense<0.000000e+00> : vector<16x128xf32>
    %9 = tpu.matmul %7, %8, %cst_8 {dimension_numbers = #tpu.dot_dimension_numbers<[1], [0], [0], [1], [0, 0, 1, 1], [], []>} : vector<16x512xf32>, vector<512x128xf32>, vector<16x128xf32> -> vector<16x128xf32>
    %c0_9 = arith.constant 0 : index
    %c0_10 = arith.constant 0 : index
    %10 = vector.load %arg6[%c0_9, %c0_10] : memref<1x128xf32, #tpu.memory_space<vmem>>, vector<1x128xf32>
    %11 = vector.broadcast %10 : vector<1x128xf32> to vector<16x128xf32>
    %12 = arith.addf %9, %11 : vector<16x128xf32>
    %c0_11 = arith.constant 0 : index
    %13 = memref.load %arg1[%c0_11] : memref<1xi32, #tpu.memory_space<smem>>
    %14 = tpu.iota {dimensions = array<i32: 0>} : vector<16x128xi32>
    %15 = tpu.iota {dimensions = array<i32: 1>} : vector<16x128xi32>
    %c16_i32 = arith.constant 16 : i32
    %16 = arith.muli %arg0, %c16_i32 : i32
    %17 = vector.broadcast %16 : i32 to vector<16x128xi32>
    %18 = arith.addi %17, %14 : vector<16x128xi32>
    %c128_i32 = arith.constant 128 : i32
    %19 = vector.broadcast %c128_i32 : i32 to vector<16x128xi32>
    %20 = arith.muli %18, %19 : vector<16x128xi32>
    %21 = arith.addi %20, %15 : vector<16x128xi32>
    %22 = vector.broadcast %13 : i32 to vector<16x128xi32>
    %23 = arith.xori %21, %22 : vector<16x128xi32>
    %c-1640531535_i32 = arith.constant -1640531535 : i32
    %24 = vector.broadcast %c-1640531535_i32 : i32 to vector<16x128xi32>
    %25 = arith.muli %23, %24 : vector<16x128xi32>
    %c15_i32 = arith.constant 15 : i32
    %26 = vector.broadcast %c15_i32 : i32 to vector<16x128xi32>
    %27 = arith.shrui %25, %26 : vector<16x128xi32>
    %28 = arith.xori %25, %27 : vector<16x128xi32>
    %c-2048144777_i32 = arith.constant -2048144777 : i32
    %29 = vector.broadcast %c-2048144777_i32 : i32 to vector<16x128xi32>
    %30 = arith.muli %28, %29 : vector<16x128xi32>
    %c13_i32 = arith.constant 13 : i32
    %31 = vector.broadcast %c13_i32 : i32 to vector<16x128xi32>
    %32 = arith.shrui %30, %31 : vector<16x128xi32>
    %33 = arith.xori %30, %32 : vector<16x128xi32>
    %c-1028477379_i32 = arith.constant -1028477379 : i32
    %34 = vector.broadcast %c-1028477379_i32 : i32 to vector<16x128xi32>
    %35 = arith.muli %33, %34 : vector<16x128xi32>
    %c16_i32_12 = arith.constant 16 : i32
    %36 = vector.broadcast %c16_i32_12 : i32 to vector<16x128xi32>
    %37 = arith.shrui %35, %36 : vector<16x128xi32>
    %38 = arith.xori %35, %37 : vector<16x128xi32>
    %c858993459_i32 = arith.constant 858993459 : i32
    %39 = vector.broadcast %c858993459_i32 : i32 to vector<16x128xi32>
    %40 = arith.cmpi uge, %38, %39 : vector<16x128xi32>
    %cst_13 = arith.constant 1.250000e+00 : f32
    %41 = vector.broadcast %cst_13 : f32 to vector<16x128xf32>
    %42 = arith.mulf %12, %41 : vector<16x128xf32>
    %cst_14 = arith.constant 0.000000e+00 : f32
    %43 = vector.broadcast %cst_14 : f32 to vector<16x128xf32>
    %44 = arith.select %40, %42, %43 : vector<16x128xi1>, vector<16x128xf32>
    %c0_15 = arith.constant 0 : index
    %c0_16 = arith.constant 0 : index
    %45 = vector.load %arg7[%c0_15, %c0_16] : memref<16x128xf32, #tpu.memory_space<vmem>>, vector<16x128xf32>
    tpu.vector_store %arg7[%c0_15, %c0_16], %44 {strides = array<i32>} : memref<16x128xf32, #tpu.memory_space<vmem>>, vector<16x128xf32>,
    return
  }
  func.func @transform_0(%arg0: i32, %arg1: memref<1xi32, #tpu.memory_space<smem>>) -> (i32, i32) {
    %c0_i32 = arith.constant 0 : i32
    %c0_i32_0 = arith.constant 0 : i32
    return %arg0, %c0_i32 : i32, i32
  }
  func.func @transform_1(%arg0: i32, %arg1: memref<1xi32, #tpu.memory_space<smem>>) -> (i32, i32) {
    %c0_i32 = arith.constant 0 : i32
    %c0_i32_0 = arith.constant 0 : i32
    %c0_i32_1 = arith.constant 0 : i32
    return %c0_i32, %c0_i32_0 : i32, i32
  }
  func.func @transform_2(%arg0: i32, %arg1: memref<1xi32, #tpu.memory_space<smem>>) -> (i32, i32) {
    %c0_i32 = arith.constant 0 : i32
    %c0_i32_0 = arith.constant 0 : i32
    %c0_i32_1 = arith.constant 0 : i32
    return %c0_i32, %c0_i32_0 : i32, i32
  }
  func.func @transform_3(%arg0: i32, %arg1: memref<1xi32, #tpu.memory_space<smem>>) -> (i32, i32) {
    %c0_i32 = arith.constant 0 : i32
    %c0_i32_0 = arith.constant 0 : i32
    %c0_i32_1 = arith.constant 0 : i32
    return %c0_i32, %c0_i32_0 : i32, i32
  }
  func.func @transform_4(%arg0: i32, %arg1: memref<1xi32, #tpu.memory_space<smem>>) -> (i32, i32) {
    %c0_i32 = arith.constant 0 : i32
    %c0_i32_0 = arith.constant 0 : i32
    %c0_i32_1 = arith.constant 0 : i32
    return %c0_i32, %c0_i32_0 : i32, i32
  }
  func.func @transform_5(%arg0: i32, %arg1: memref<1xi32, #tpu.memory_space<smem>>) -> (i32, i32) {
    %c0_i32 = arith.constant 0 : i32
    %c0_i32_0 = arith.constant 0 : i32
    return %arg0, %c0_i32 : i32, i32
  }
}

</mosaic_0001>

<bundles_post_ra>
// kernel: feed_forward.1
= control target key start
LH: loop header
LB: loop body
LE: loop exit
PB: predicated region body
PF: predicated region fallthrough
CT: control target
= control target key end

     0   :  { %12 = vsyncpa [#allocation5], 0  ;;  %s1018_s0 = inlined_call_operand.<no memory space> [shape: s32[1], index: 0, kind: input, shape index: {}]   ;;  %s1019_s1 = inlined_call_operand.hbm [shape: f32[16,128], index: 1, kind: input, shape index: {}]   ;;  %s1020_s2 = inlined_call_operand.hbm [shape: f32[128,512], index: 2, kind: input, shape index: {}]   ;;  %s1021_s3 = inlined_call_operand.vmem [shape: f32[1,512], index: 3, kind: input, shape index: {}]   ;;  %s1022_s4 = inlined_call_operand.hbm [shape: f32[512,128], index: 4, kind: input, shape index: {}]   ;;  %s1023_s5 = inlined_call_operand.vmem [shape: f32[1,128], index: 5, kind: input, shape index: {}]   ;;  %s1024_s6 = inlined_call_operand.hbm [shape: f32[16,128], index: 6, kind: output, shape index: {}]  }
   0x1   :  { %13 = vsyncpa [#allocation8], 0 }
   0x2   :  { %14 = vsyncpa [#allocation6], 0  ;;  %s904_s21 = smov [#allocation7]   ;;  %s810_s25 = scalar_lea.hbm %s1020_s2, 8192 }
   0x3   :  { %s32_s22 = sshll.u32 %s904_s21, 4  ;;  %p811_p0 = scmp.ne.s32.totalorder %s1020_s2, %s810_s25  ;;  %s33_s22 = int_to_ptr.vmem [resolvable:$true] %s32_s22 }
   0x4   :  { %p814_p1 = scmp.lt.u32.totalorder %s810_s25, %s1020_s2 }
   0x6   :  { %p816_p2 = pnand %p814_p1, %p811_p0 }
   0x8   :  { %819 = shalt.err (!%p816_p2)
}
   0x9   :  { %s820_s30 = scalar_lea.vmem %s33_s22, 8192  ;;  %p825_p4 = scmp.lt.s32.totalorder %s33_s22, %s33_s22 }
   0xa   :  { %p821_p3 = scmp.ne.s32.totalorder %s33_s22, %s820_s30  ;;  %p826_p5 = scmp.lt.s32.totalorder %s820_s30, %s820_s30 }
   0xc   :  { %p827_p6 = por %p826_p5, %p825_p4 }
   0xe   :  { %p828_p7 = pnand %p827_p6, %p821_p3 }
  0x10   :  { %831 = shalt.err (!%p828_p7)
}
  0x11   :  { %s905_s7 = smov 512   ;;  %s906_s8 = smov 32  }
  0x12   :  { %38 = dma.hbm_to_vmem [thread:$0]  %s1020_s2, 8192, %s33_s22, [#allocation8], %s905_s7, %s905_s7, %s906_s8  }
  0x13   :  { %s907_s11 = smov [#allocation4]   ;;  %s832_s15 = scalar_lea.hbm %s1019_s1, 256 }
  0x14   :  { %s20_s12 = sshll.u32 %s907_s11, 4  ;;  %p833_p8 = scmp.ne.s32.totalorder %s1019_s1, %s832_s15  ;;  %s21_s12 = int_to_ptr.vmem [resolvable:$true] %s20_s12 }
  0x15   :  { %p836_p9 = scmp.lt.u32.totalorder %s832_s15, %s1019_s1 }
  0x17   :  { %p838_p10 = pnand %p836_p9, %p833_p8 }
  0x19   :  { %841 = shalt.err (!%p838_p10)
}
  0x1a   :  { %s842_s20 = scalar_lea.vmem %s21_s12, 256  ;;  %p847_p12 = scmp.lt.s32.totalorder %s21_s12, %s21_s12 }
  0x1b   :  { %p843_p11 = scmp.ne.s32.totalorder %s21_s12, %s842_s20  ;;  %p848_p13 = scmp.lt.s32.totalorder %s842_s20, %s842_s20 }
  0x1d   :  { %p849_p0 = por %p848_p13, %p847_p12 }
  0x1f   :  { %p850_p1 = pnand %p849_p0, %p843_p11 }
  0x21   :  { %853 = shalt.err (!%p850_p1)
}
  0x22   :  { %s908_s2 = smov 128   ;;  %s909_s21 = smov 8  }
  0x23   :  { %26 = dma.hbm_to_vmem [thread:$0]  %s1019_s1, 256, %s21_s12, [#allocation5], %s908_s2, %s908_s2, %s909_s21  }
  0x24   :  { %s910_s24 = smov [#allocation9]   ;;  %s854_s28 = scalar_lea.hbm %s1022_s4, 8192 }
  0x25   :  { %s46_s25 = sshll.u32 %s910_s24, 4  ;;  %p855_p2 = scmp.ne.s32.totalorder %s1022_s4, %s854_s28  ;;  %s47_s25 = int_to_ptr.vmem [resolvable:$true] %s46_s25 }
  0x26   :  { %p858_p3 = scmp.lt.u32.totalorder %s854_s28, %s1022_s4 }
  0x28   :  { %p860_p4 = pnand %p858_p3, %p855_p2 }
  0x2a   :  { %863 = shalt.err (!%p860_p4)
}
  0x2b   :  { %s864_s9 = scalar_lea.vmem %s47_s25, 8192  ;;  %p869_p6 = scmp.lt.s32.totalorder %s47_s25, %s47_s25 }
  0x2c   :  { %p865_p5 = scmp.ne.s32.totalorder %s47_s25, %s864_s9  ;;  %p870_p7 = scmp.lt.s32.totalorder %s864_s9, %s864_s9 }
  0x2e   :  { %p871_p8 = por %p870_p7, %p869_p6 }
  0x30   :  { %p872_p9 = pnand %p871_p8, %p865_p5 }
  0x32   :  { %875 = shalt.err (!%p872_p9)
}
  0x33   :  { %52 = dma.hbm_to_vmem [thread:$0]  %s1022_s4, 8192, %s47_s25, [#allocation8], %s908_s2, %s908_s2, %s909_s21  }
  0x34   :  { %898 = dma.done.wait [#allocation5], 256  }
  0x35   :  { %899 = vsyncadd [#allocation5], 4294967040 }
  0x36   :  { %900 = dma.done.wait [#allocation8], 16384  }
  0x37   :  { %901 = vsyncadd [#allocation8], 4294950912  ;;  %v911_v0 = vmov 0.0   ;;  %v67_v1 = vld [vmem:[#allocation7 + $0x8] sm:$0xff]  ;;  %v69_v3 = vld [vmem:[#allocation7 + $0x18] sm:$0xff] }
  0x38   :  { %216 = vmatprep.mubr.f32.mxu0 %v911_v0  ;;  %293 = vmatprep.mubr.f32.mxu1 %v911_v0  ;;  %v71_v2 = vld [vmem:[#allocation7 + $0x28] sm:$0xff]  ;;  %v73_v5 = vld [vmem:[#allocation7 + $0x38] sm:$0xff]  ;;  %v66_v6 = vld [vmem:[#allocation7] sm:$0xff] }
  0x39   :  { %v673_v4 = vpack.c.bf16 %v71_v2, %v67_v1  ;;  %v70_v7 = vld [vmem:[#allocation7 + $0x20] sm:$0xff]  ;;  %v705_v8 = vpack.c.bf16 %v73_v5, %v69_v3  ;;  %v68_v10 = vld [vmem:[#allocation7 + $0x10] sm:$0xff]  ;;  %v75_v12 = vld [vmem:[#allocation7 + $0x48] sm:$0xff] }
  0x3a   :  { %v675_v9 = vpack.c.bf16 %v70_v7, %v66_v6  ;;  %v72_v11 = vld [vmem:[#allocation7 + $0x30] sm:$0xff]  ;;  %v79_v14 = vld [vmem:[#allocation7 + $0x68] sm:$0xff]  ;;  %v77_v15 = vld [vmem:[#allocation7 + $0x58] sm:$0xff] }
  0x3b   :  { %674 = vmatprep.subr.bf16.mxu0 %v673_v4  ;;  %v707_v13 = vpack.c.bf16 %v72_v11, %v68_v10  ;;  %v81_v16 = vld [vmem:[#allocation7 + $0x78] sm:$0xff]  ;;  %706 = vmatprep.subr.bf16.mxu1 %v705_v8  ;;  %v677_v17 = vpack.c.bf16 %v79_v14, %v75_v12  ;;  %v74_v19 = vld [vmem:[#allocation7 + $0x40] sm:$0xff]  ;;  %v76_v21 = vld [vmem:[#allocation7 + $0x50] sm:$0xff] }
  0x3c   :  { %676 = vmatpush1.bf16.msra.mxu0 %v675_v9  ;;  %v709_v18 = vpack.c.bf16 %v81_v16, %v77_v15  ;;  %v78_v20 = vld [vmem:[#allocation7 + $0x60] sm:$0xff]  ;;  %v80_v23 = vld [vmem:[#allocation7 + $0x70] sm:$0xff]  ;;  %v83_v24 = vld [vmem:[#allocation7 + $0x88] sm:$0xff] }
  0x3d   :  { %708 = vmatpush1.bf16.msra.mxu1 %v707_v13  ;;  %v679_v22 = vpack.c.bf16 %v78_v20, %v74_v19  ;;  %v87_v25 = vld [vmem:[#allocation7 + $0xa8] sm:$0xff]  ;;  %678 = vmatprep.subr.bf16.mxu0 %v677_v17  ;;  %v711_v26 = vpack.c.bf16 %v80_v23, %v76_v21  ;;  %v85_v28 = vld [vmem:[#allocation7 + $0x98] sm:$0xff]  ;;  %v82_v30 = vld [vmem:[#allocation7 + $0x80] sm:$0xff] }
  0x3e   :  { %710 = vmatprep.subr.bf16.mxu1 %v709_v18  ;;  %v681_v27 = vpack.c.bf16 %v87_v25, %v83_v24  ;;  %v89_v29 = vld [vmem:[#allocation7 + $0xb8] sm:$0xff]  ;;  %v86_v32 = vld [vmem:[#allocation7 + $0xa0] sm:$0xff]  ;;  %v84_v33 = vld [vmem:[#allocation7 + $0x90] sm:$0xff] }
  0x3f   :  { %v713_v31 = vpack.c.bf16 %v89_v29, %v85_v28  ;;  %v88_v34 = vld [vmem:[#allocation7 + $0xb0] sm:$0xff]  ;;  %v683_v35 = vpack.c.bf16 %v86_v32, %v82_v30  ;;  %v91_v36 = vld [vmem:[#allocation7 + $0xc8] sm:$0xff]  ;;  %v93_v38 = vld [vmem:[#allocation7 + $0xd8] sm:$0xff] }
  0x40   :  { %680 = vmatpush1.bf16.msra.mxu0 %v679_v22  ;;  %v95_v37 = vld [vmem:[#allocation7 + $0xe8] sm:$0xff]  ;;  %v715_v39 = vpack.c.bf16 %v88_v34, %v84_v33  ;;  %v97_v41 = vld [vmem:[#allocation7 + $0xf8] sm:$0xff]  ;;  %v90_v42 = vld [vmem:[#allocation7 + $0xc0] sm:$0xff] }
  0x41   :  { %712 = vmatpush1.bf16.msra.mxu1 %v711_v26  ;;  %682 = vmatprep.subr.bf16.mxu0 %v681_v27  ;;  %v685_v40 = vpack.c.bf16 %v95_v37, %v91_v36  ;;  %v94_v43 = vld [vmem:[#allocation7 + $0xe0] sm:$0xff]  ;;  %v717_v44 = vpack.c.bf16 %v97_v41, %v93_v38  ;;  %v92_v45 = vld [vmem:[#allocation7 + $0xd0] sm:$0xff]  ;;  %v99_v47 = vld [vmem:[#allocation7 + $0x108] sm:$0xff] }
  0x42   :  { %714 = vmatprep.subr.bf16.mxu1 %v713_v31  ;;  %v96_v46 = vld [vmem:[#allocation7 + $0xf0] sm:$0xff]  ;;  %v103_v48 = vld [vmem:[#allocation7 + $0x128] sm:$0xff]  ;;  %v101_v49 = vld [vmem:[#allocation7 + $0x118] sm:$0xff]  ;;  %v687_v51 = vpack.c.bf16 %v94_v43, %v90_v42 }
  0x43   :  { %v105_v50 = vld [vmem:[#allocation7 + $0x138] sm:$0xff]  ;;  %v719_v52 = vpack.c.bf16 %v96_v46, %v92_v45  ;;  %v689_v53 = vpack.c.bf16 %v103_v48, %v99_v47  ;;  %v98_v54 = vld [vmem:[#allocation7 + $0x100] sm:$0xff]  ;;  %v100_v56 = vld [vmem:[#allocation7 + $0x110] sm:$0xff] }
  0x44   :  { %684 = vmatpush1.bf16.msra.mxu0 %v683_v35  ;;  %v102_v55 = vld [vmem:[#allocation7 + $0x120] sm:$0xff]  ;;  %v721_v57 = vpack.c.bf16 %v105_v50, %v101_v49  ;;  %v104_v58 = vld [vmem:[#allocation7 + $0x130] sm:$0xff]  ;;  %v107_v59 = vld [vmem:[#allocation7 + $0x148] sm:$0xff] }
  0x45   :  { %716 = vmatpush1.bf16.msra.mxu1 %v715_v39  ;;  %686 = vmatprep.subr.bf16.mxu0 %v685_v40  ;;  %v111_v60 = vld [vmem:[#allocation7 + $0x168] sm:$0xff]  ;;  %v109_v61 = vld [vmem:[#allocation7 + $0x158] sm:$0xff]  ;;  %v691_v63 = vpack.c.bf16 %v102_v55, %v98_v54  ;;  %v723_v1 = vpack.c.bf16 %v104_v58, %v100_v56  ;;  %v106_v3 = vld [vmem:[#allocation7 + $0x140] sm:$0xff] }
  0x46   :  { %718 = vmatprep.subr.bf16.mxu1 %v717_v44  ;;  %v113_v62 = vld [vmem:[#allocation7 + $0x178] sm:$0xff]  ;;  %v693_v2 = vpack.c.bf16 %v111_v60, %v107_v59  ;;  %v110_v4 = vld [vmem:[#allocation7 + $0x160] sm:$0xff]  ;;  %v108_v5 = vld [vmem:[#allocation7 + $0x150] sm:$0xff] }
  0x47   :  { %v725_v6 = vpack.c.bf16 %v113_v62, %v109_v61  ;;  %v112_v7 = vld [vmem:[#allocation7 + $0x170] sm:$0xff]  ;;  %v115_v8 = vld [vmem:[#allocation7 + $0x188] sm:$0xff]  ;;  %v117_v10 = vld [vmem:[#allocation7 + $0x198] sm:$0xff]  ;;  %v695_v12 = vpack.c.bf16 %v110_v4, %v106_v3 }
  0x48   :  { %688 = vmatpush1.bf16.msra.mxu0 %v687_v51  ;;  %v119_v9 = vld [vmem:[#allocation7 + $0x1a8] sm:$0xff]  ;;  %v121_v11 = vld [vmem:[#allocation7 + $0x1b8] sm:$0xff]  ;;  %v727_v13 = vpack.c.bf16 %v112_v7, %v108_v5  ;;  %v114_v15 = vld [vmem:[#allocation7 + $0x180] sm:$0xff] }
  0x49   :  { %720 = vmatpush1.bf16.msra.mxu1 %v719_v52  ;;  %690 = vmatprep.subr.bf16.mxu0 %v689_v53  ;;  %v697_v14 = vpack.c.bf16 %v119_v9, %v115_v8  ;;  %v118_v16 = vld [vmem:[#allocation7 + $0x1a0] sm:$0xff]  ;;  %v116_v17 = vld [vmem:[#allocation7 + $0x190] sm:$0xff]  ;;  %v729_v18 = vpack.c.bf16 %v121_v11, %v117_v10  ;;  %v123_v20 = vld [vmem:[#allocation7 + $0x1c8] sm:$0xff] }
  0x4a   :  { %722 = vmatprep.subr.bf16.mxu1 %v721_v57  ;;  %v120_v19 = vld [vmem:[#allocation7 + $0x1b0] sm:$0xff]  ;;  %v127_v21 = vld [vmem:[#allocation7 + $0x1e8] sm:$0xff]  ;;  %v125_v22 = vld [vmem:[#allocation7 + $0x1d8] sm:$0xff]  ;;  %v699_v24 = vpack.c.bf16 %v118_v16, %v114_v15 }
  0x4b   :  { %v129_v23 = vld [vmem:[#allocation7 + $0x1f8] sm:$0xff]  ;;  %v731_v25 = vpack.c.bf16 %v120_v19, %v116_v17  ;;  %v701_v26 = vpack.c.bf16 %v127_v21, %v123_v20  ;;  %v122_v27 = vld [vmem:[#allocation7 + $0x1c0] sm:$0xff]  ;;  %v124_v29 = vld [vmem:[#allocation7 + $0x1d0] sm:$0xff] }
  0x4c   :  { %692 = vmatpush1.bf16.msra.mxu0 %v691_v63  ;;  %v126_v28 = vld [vmem:[#allocation7 + $0x1e0] sm:$0xff]  ;;  %v733_v30 = vpack.c.bf16 %v129_v23, %v125_v22  ;;  %v128_v31 = vld [vmem:[#allocation7 + $0x1f0] sm:$0xff]  ;;  %v331_v33 = vld [vmem:[#allocation9 + $0x88] sm:$0xff] }
  0x4d   :  { %724 = vmatpush1.bf16.msra.mxu1 %v723_v1  ;;  %694 = vmatprep.subr.bf16.mxu0 %v693_v2  ;;  %v330_v32 = vld [vmem:[#allocation9 + $0x80] sm:$0xff]  ;;  %v363_v35 = vld [vmem:[#allocation9 + $0x188] sm:$0xff]  ;;  %v703_v36 = vpack.c.bf16 %v126_v28, %v122_v27  ;;  %v735_v37 = vpack.c.bf16 %v128_v31, %v124_v29  ;;  %v332_v44 = vld [vmem:[#allocation9 + $0x90] sm:$0xff] }
  0x4e   :  { %726 = vmatprep.subr.bf16.mxu1 %v725_v6  ;;  %v362_v34 = vld [vmem:[#allocation9 + $0x180] sm:$0xff]  ;;  %v737_v38 = vpack.c.bf16 %v331_v33, %v330_v32  ;;  %v315_v41 = vld [vmem:[#allocation9 + $0x8] sm:$0xff]  ;;  %v333_v45 = vld [vmem:[#allocation9 + $0x98] sm:$0xff] }
  0x4f   :  { %v769_v39 = vpack.c.bf16 %v363_v35, %v362_v34  ;;  %v314_v40 = vld [vmem:[#allocation9] sm:$0xff]  ;;  %v347_v43 = vld [vmem:[#allocation9 + $0x108] sm:$0xff]  ;;  %v64_v46 = vld [vmem:[#allocation4] sm:$0xff]  ;;  %v741_v51 = vpack.c.bf16 %v333_v45, %v332_v44 }
  0x50   :  { %696 = vmatpush1.bf16.msra.mxu0 %v695_v12  ;;  %v346_v42 = vld [vmem:[#allocation9 + $0x100] sm:$0xff]  ;;  %v364_v47 = vld [vmem:[#allocation9 + $0x190] sm:$0xff]  ;;  %v365_v48 = vld [vmem:[#allocation9 + $0x198] sm:$0xff]  ;;  %v739_v49 = vpack.c.bf16 %v315_v41, %v314_v40 }
  0x51   :  { %728 = vmatpush1.bf16.msra.mxu1 %v727_v13  ;;  %698 = vmatprep.subr.bf16.mxu0 %v697_v14  ;;  %v771_v50 = vpack.c.bf16 %v347_v43, %v346_v42  ;;  %v316_v52 = vld [vmem:[#allocation9 + $0x10] sm:$0xff]  ;;  %v317_v53 = vld [vmem:[#allocation9 + $0x18] sm:$0xff]  ;;  %v773_v55 = vpack.c.bf16 %v365_v48, %v364_v47  ;;  %v334_v57 = vld [vmem:[#allocation9 + $0xa0] sm:$0xff] }
  0x52   :  { %730 = vmatprep.subr.bf16.mxu1 %v729_v18  ;;  %v348_v54 = vld [vmem:[#allocation9 + $0x110] sm:$0xff]  ;;  %v349_v56 = vld [vmem:[#allocation9 + $0x118] sm:$0xff]  ;;  %v335_v58 = vld [vmem:[#allocation9 + $0xa8] sm:$0xff]  ;;  %v743_v62 = vpack.c.bf16 %v317_v53, %v316_v52 }
  0x53   :  { %v65_v59 = vld [vmem:[#allocation4 + $0x8] sm:$0xff]  ;;  %v366_v60 = vld [vmem:[#allocation9 + $0x1a0] sm:$0xff]  ;;  %v367_v61 = vld [vmem:[#allocation9 + $0x1a8] sm:$0xff]  ;;  %v775_v63 = vpack.c.bf16 %v349_v56, %v348_v54  ;;  %v745_v1 = vpack.c.bf16 %v335_v58, %v334_v57 }
  0x54   :  { %700 = vmatpush1.bf16.msra.mxu0 %v699_v24  ;;  %v318_v2 = vld [vmem:[#allocation9 + $0x20] sm:$0xff]  ;;  %v319_v3 = vld [vmem:[#allocation9 + $0x28] sm:$0xff]  ;;  %v777_v5 = vpack.c.bf16 %v367_v61, %v366_v60  ;;  %v336_v7 = vld [vmem:[#allocation9 + $0xb0] sm:$0xff] }
  0x55   :  { %732 = vmatpush1.bf16.msra.mxu1 %v731_v25  ;;  %702 = vmatprep.subr.bf16.mxu0 %v701_v26  ;;  %v350_v4 = vld [vmem:[#allocation9 + $0x120] sm:$0xff]  ;;  %v351_v6 = vld [vmem:[#allocation9 + $0x128] sm:$0xff]  ;;  %v337_v8 = vld [vmem:[#allocation9 + $0xb8] sm:$0xff] }
  0x56   :  { %734 = vmatprep.subr.bf16.mxu1 %v733_v30  ;;  %v368_v9 = vld [vmem:[#allocation9 + $0x1b0] sm:$0xff]  ;;  %v369_v10 = vld [vmem:[#allocation9 + $0x1b8] sm:$0xff]  ;;  %v779_v11 = vpack.c.bf16 %v351_v6, %v350_v4  ;;  %v749_v12 = vpack.c.bf16 %v337_v8, %v336_v7  ;;  %v338_v18 = vld [vmem:[#allocation9 + $0xc0] sm:$0xff] }
  0x57   :  { %v320_v13 = vld [vmem:[#allocation9 + $0x30] sm:$0xff]  ;;  %v321_v14 = vld [vmem:[#allocation9 + $0x38] sm:$0xff]  ;;  %v781_v16 = vpack.c.bf16 %v369_v10, %v368_v9  ;;  %v339_v19 = vld [vmem:[#allocation9 + $0xc8] sm:$0xff] }
  0x58   :  { %704 = vmatpush1.bf16.msra.mxu0 %v703_v36  ;;  %v352_v15 = vld [vmem:[#allocation9 + $0x130] sm:$0xff]  ;;  %v353_v17 = vld [vmem:[#allocation9 + $0x138] sm:$0xff]  ;;  %v370_v20 = vld [vmem:[#allocation9 + $0x1c0] sm:$0xff]  ;;  %v751_v22 = vpack.c.bf16 %v321_v14, %v320_v13  ;;  %v753_v24 = vpack.c.bf16 %v339_v19, %v338_v18 }
  0x59   :  { %736 = vmatpush1.bf16.msra.mxu1 %v735_v37  ;;  %738 = vmatprep.subr.bf16.mxu0 %v737_v38  ;;  %v371_v21 = vld [vmem:[#allocation9 + $0x1c8] sm:$0xff]  ;;  %v783_v23 = vpack.c.bf16 %v353_v17, %v352_v15  ;;  %v322_v25 = vld [vmem:[#allocation9 + $0x40] sm:$0xff]  ;;  %v340_v30 = vld [vmem:[#allocation9 + $0xd0] sm:$0xff] }
  0x5a   :  { %770 = vmatprep.subr.bf16.mxu1 %v769_v39  ;;  %v323_v26 = vld [vmem:[#allocation9 + $0x48] sm:$0xff]  ;;  %v354_v27 = vld [vmem:[#allocation9 + $0x140] sm:$0xff]  ;;  %v785_v28 = vpack.c.bf16 %v371_v21, %v370_v20  ;;  %v341_v31 = vld [vmem:[#allocation9 + $0xd8] sm:$0xff] }
  0x5b   :  { %217 = vmatmul.mubr.f32.vlgmr.msra.gmra.mrb[0].mxu0 %v64_v46  ;;  %v355_v29 = vld [vmem:[#allocation9 + $0x148] sm:$0xff]  ;;  %v372_v32 = vld [vmem:[#allocation9 + $0x1d0] sm:$0xff]  ;;  %v373_v33 = vld [vmem:[#allocation9 + $0x1d8] sm:$0xff]  ;;  %v755_v34 = vpack.c.bf16 %v323_v26, %v322_v25  ;;  %v757_v36 = vpack.c.bf16 %v341_v31, %v340_v30 }
  0x5c   :  { %294 = vmatmul.mubr.f32.vlgmr.msra.gmra.mrb[0].mxu1 %v64_v46  ;;  %222 = vmatprep.mubr.f32.mxu0 %v911_v0  ;;  %v787_v35 = vpack.c.bf16 %v355_v29, %v354_v27  ;;  %v324_v37 = vld [vmem:[#allocation9 + $0x50] sm:$0xff]  ;;  %v325_v38 = vld [vmem:[#allocation9 + $0x58] sm:$0xff]  ;;  %v789_v40 = vpack.c.bf16 %v373_v33, %v372_v32  ;;  %v342_v42 = vld [vmem:[#allocation9 + $0xe0] sm:$0xff] }
  0x5d   :  { %299 = vmatprep.mubr.f32.mxu1 %v911_v0  ;;  %740 = vmatpush3.bf16.msra.mxu0 %v739_v49  ;;  %v747_v0 = vpack.c.bf16 %v319_v3, %v318_v2  ;;  %v356_v39 = vld [vmem:[#allocation9 + $0x150] sm:$0xff]  ;;  %v357_v41 = vld [vmem:[#allocation9 + $0x158] sm:$0xff]  ;;  %v343_v43 = vld [vmem:[#allocation9 + $0xe8] sm:$0xff]  ;;  %v759_v46 = vpack.c.bf16 %v325_v38, %v324_v37 }
  0x5e   :  { %772 = vmatpush3.bf16.msra.mxu1 %v771_v50  ;;  %742 = vmatprep.subr.bf16.mxu0 %v741_v51  ;;  %v374_v44 = vld [vmem:[#allocation9 + $0x1e0] sm:$0xff]  ;;  %v375_v45 = vld [vmem:[#allocation9 + $0x1e8] sm:$0xff]  ;;  %v791_v47 = vpack.c.bf16 %v357_v41, %v356_v39  ;;  %v761_v48 = vpack.c.bf16 %v343_v43, %v342_v42  ;;  %v344_v56 = vld [vmem:[#allocation9 + $0xf0] sm:$0xff] }
  0x5f   :  { %223 = vmatmul.mubr.f32.gmra.mrb[2].mxu0 %v65_v59  ;;  %774 = vmatprep.subr.bf16.mxu1 %v773_v55  ;;  %v793_v49 = vpack.c.bf16 %v375_v45, %v374_v44  ;;  %v326_v50 = vld [vmem:[#allocation9 + $0x60] sm:$0xff]  ;;  %v327_v51 = vld [vmem:[#allocation9 + $0x68] sm:$0xff]  ;;  %v345_v57 = vld [vmem:[#allocation9 + $0xf8] sm:$0xff]  ;;  %v549_v44 = vstv %s1018_s0 }
  0x60   :  { %300 = vmatmul.mubr.f32.gmra.mrb[2].mxu1 %v65_v59  ;;  %v358_v52 = vld [vmem:[#allocation9 + $0x160] sm:$0xff]  ;;  %v763_v53 = vpack.c.bf16 %v327_v51, %v326_v50  ;;  %v359_v54 = vld [vmem:[#allocation9 + $0x168] sm:$0xff]  ;;  %v376_v58 = vld [vmem:[#allocation9 + $0x1f0] sm:$0xff]  ;;  %v765_v59 = vpack.c.bf16 %v345_v57, %v344_v56 }
  0x61   :  { %744 = vmatpush3.bf16.msra.mxu0 %v743_v62  ;;  %v795_v55 = vpack.c.bf16 %v359_v54, %v358_v52  ;;  %v377_v60 = vld [vmem:[#allocation9 + $0x1f8] sm:$0xff]  ;;  %v328_v61 = vld [vmem:[#allocation9 + $0x70] sm:$0xff] }
  0x62   :  { %776 = vmatpush3.bf16.msra.mxu1 %v775_v63  ;;  %746 = vmatprep.subr.bf16.mxu0 %v745_v1  ;;  %v329_v62 = vld [vmem:[#allocation9 + $0x78] sm:$0xff]  ;;  %v797_v63 = vpack.c.bf16 %v377_v60, %v376_v58  ;;  %v360_v2 = vld [vmem:[#allocation9 + $0x170] sm:$0xff] }
  0x63   :  { %778 = vmatprep.subr.bf16.mxu1 %v777_v5  ;;  %v767_v1 = vpack.c.bf16 %v329_v62, %v328_v61  ;;  %v361_v3 = vld [vmem:[#allocation9 + $0x178] sm:$0xff]  ;;  %v132_v5 = vlaneseq  ;;  %v130_v8 = vld [vmem:[%s1021_s3] sm:$0xf] }
  0x64   :  { %v799_v4 = vpack.c.bf16 %v361_v3, %v360_v2  ;;  %v596_v2 = vld [vmem:[%s1023_s5] ss:$0 sm:$0xff]  ;;  %s912_s5 = smov [#allocation10]  }
  0x65   :  { %748 = vmatpush3.bf16.msra.mxu0 %v747_v0  ;;  %v133_v6 = vshrl.u32 %v132_v5, 7  ;;  %s583_s14 = sshll.u32 %s912_s5, 4  ;;  %s584_s14 = int_to_ptr.vmem [resolvable:$true] %s583_s14 }
  0x66   :  { %780 = vmatpush3.bf16.msra.mxu1 %v779_v11  ;;  %750 = vmatprep.subr.bf16.mxu0 %v749_v12  ;;  %s876_s15 = scalar_lea.vmem %s584_s14, 256  ;;  %p881_p11 = scmp.lt.s32.totalorder %s584_s14, %s584_s14 }
  0x67   :  { %782 = vmatprep.subr.bf16.mxu1 %v781_v16  ;;  %v134_v7 = vsub.s32 0, %v133_v6  ;;  %v142_v9 = vsub.s32 2, %v133_v6  ;;  %v138_v10 = vsub.s32 1, %v133_v6  ;;  %v146_v0 = vsub.s32 3, %v133_v6  ;;  %p877_p10 = scmp.ne.s32.totalorder %s584_s14, %s876_s15  ;;  %p882_p12 = scmp.lt.s32.totalorder %s876_s15, %s876_s15 }
  0x68   :  { %v538_v39 = vadd.s32 8, %v133_v6  ;;  %v545_v41 = vmul.u32 128, %v133_v6 }
  0x69   :  { %752 = vmatpush3.bf16.msra.mxu0 %v751_v22  ;;  %v135_v11 = vrot.slane %v130_v8, %v134_v7  ;;  %v143_v12 = vrot.slane %v130_v8, %v142_v9  ;;  %v139_v13 = vrot.slane %v130_v8, %v138_v10  ;;  %v147_v14 = vrot.slane %v130_v8, %v146_v0  ;;  %p883_p13 = por %p882_p12, %p881_p11 }
  0x6a   :  { %784 = vmatpush3.bf16.msra.mxu1 %v783_v23  ;;  %754 = vmatprep.subr.bf16.mxu0 %v753_v24  ;;  %v546_v42 = vmul.u32 128, %v538_v39 }
  0x6b   :  { %786 = vmatprep.subr.bf16.mxu1 %v785_v28  ;;  %p884_p0 = pnand %p883_p13, %p877_p10 }
  0x6d   :  { %756 = vmatpush3.bf16.msra.mxu0 %v755_v34 }
  0x6e   :  { %788 = vmatpush3.bf16.msra.mxu1 %v787_v35  ;;  %758 = vmatprep.subr.bf16.mxu0 %v757_v36 }
  0x6f   :  { %790 = vmatprep.subr.bf16.mxu1 %v789_v40  ;;  %v540_v40 = vand.u32 127, %v132_v5 }
  0x71   :  { %760 = vmatpush3.bf16.msra.mxu0 %v759_v46  ;;  %v547_v43 = vadd.s32 %v545_v41, %v540_v40  ;;  %v548_v45 = vadd.s32 %v546_v42, %v540_v40 }
  0x72   :  { %792 = vmatpush3.bf16.msra.mxu1 %v791_v47  ;;  %762 = vmatprep.subr.bf16.mxu0 %v761_v48 }
  0x73   :  { %794 = vmatprep.subr.bf16.mxu1 %v793_v49  ;;  %v550_v46 = vxor.u32 %v549_v44, %v547_v43  ;;  %v551_v47 = vxor.u32 %v549_v44, %v548_v45 }
  0x75   :  { %764 = vmatpush3.bf16.msra.mxu0 %v763_v53  ;;  %v552_v48 = vmul.u32 2654435761, %v550_v46  ;;  %v553_v49 = vmul.u32 2654435761, %v551_v47 }
  0x76   :  { %796 = vmatpush3.bf16.msra.mxu1 %v795_v55  ;;  %766 = vmatprep.subr.bf16.mxu0 %v765_v59 }
  0x77   :  { %798 = vmatprep.subr.bf16.mxu1 %v797_v63  ;;  %v554_v50 = vshrl.u32 %v552_v48, 15  ;;  %v555_v51 = vshrl.u32 %v553_v49, 15 }
  0x79   :  { %768 = vmatpush3.bf16.msra.mxu0 %v767_v1  ;;  %v556_v52 = vxor.u32 %v554_v50, %v552_v48  ;;  %v557_v53 = vxor.u32 %v555_v51, %v553_v49 }
  0x7a   :  { %800 = vmatpush3.bf16.msra.mxu1 %v799_v4 }
  0x7b   :  { %v558_v54 = vmul.u32 2246822519, %v556_v52  ;;  %v559_v55 = vmul.u32 2246822519, %v557_v53 }
  0x7d   :  { %v560_v56 = vshrl.u32 %v558_v54, 13  ;;  %v561_v57 = vshrl.u32 %v559_v55, 13 }
  0x7f   :  { %v562_v58 = vxor.u32 %v560_v56, %v558_v54  ;;  %v563_v59 = vxor.u32 %v561_v57, %v559_v55 }
  0x81   :  { %v564_v60 = vmul.u32 3266489917, %v562_v58  ;;  %v565_v61 = vmul.u32 3266489917, %v563_v59 }
  0x83   :  { %v566_v62 = vshrl.u32 %v564_v60, 16  ;;  %v567_v7 = vshrl.u32 %v565_v61, 16 }
  0x85   :  { %v568_v8 = vxor.u32 %v566_v62, %v564_v60 }
  0x87   :  { %vm570_vm0 = vcmp.ge.u32.totalorder %v568_v8, 858993459 }
 0x12e   :  { %v218_v15 = vpop.f32.mrb[0].mxu0 }
 0x12f   :  { %v219_v16 = vadd.f32 %v218_v15, %v135_v11  ;;  %v295_v17 = vpop.f32.mrb[0].mxu1  ;;  %v220_v18 = vpop.f32.mrb[1].mxu0 }
 0x130   :  { %v296_v19 = vadd.f32 %v295_v17, %v143_v12  ;;  %v221_v20 = vadd.f32 %v220_v18, %v139_v13  ;;  %v297_v21 = vpop.f32.mrb[1].mxu1 }
 0x131   :  { %v298_v22 = vadd.f32 %v297_v21, %v147_v14  ;;  %v306_v26 = vmax.f32 %v219_v16, 0.0  ;;  %v569_v16 = vxor.u32 %v567_v7, %v565_v61 }
 0x132   :  { %v308_v23 = vmax.f32 %v296_v19, 0.0  ;;  %v307_v24 = vmax.f32 %v221_v20, 0.0  ;;  %v224_v25 = vpop.f32.mrb[2].mxu0 }
 0x133   :  { %v309_v27 = vmax.f32 %v298_v22, 0.0  ;;  %v225_v28 = vadd.f32 %v224_v25, %v135_v11  ;;  %v301_v29 = vpop.f32.mrb[2].mxu1  ;;  %v226_v30 = vpop.f32.mrb[3].mxu0  ;;  %vm571_vm1 = vcmp.ge.u32.totalorder %v569_v16, 858993459 }
 0x134   :  { %v302_v31 = vadd.f32 %v301_v29, %v143_v12  ;;  %v227_v32 = vadd.f32 %v226_v30, %v139_v13  ;;  %v303_v33 = vpop.f32.mrb[3].mxu1  ;;  %449 = vmatprep.mubr.f32.mxu0 %v307_v24 }
 0x135   :  { %v304_v34 = vadd.f32 %v303_v33, %v147_v14  ;;  %524 = vmatprep.mubr.f32.mxu1 %v309_v27  ;;  %450 = vmatmul.mubr.f32.vlgmr.msra.gmra.mrb[4].mxu0 %v306_v26  ;;  %v310_v37 = vmax.f32 %v225_v28, 0.0 }
 0x136   :  { %v312_v35 = vmax.f32 %v302_v31, 0.0  ;;  %v311_v36 = vmax.f32 %v227_v32, 0.0  ;;  %525 = vmatmul.mubr.f32.vlgmr.msra.gmra.mrb[4].mxu1 %v308_v23 }
 0x137   :  { %v313_v38 = vmax.f32 %v304_v34, 0.0 }
 0x138   :  { %454 = vmatprep.mubr.f32.mxu0 %v311_v36 }
 0x139   :  { %529 = vmatprep.mubr.f32.mxu1 %v313_v38  ;;  %455 = vmatmul.mubr.f32.gmra.mrb[6].mxu0 %v310_v37 }
 0x13a   :  { %530 = vmatmul.mubr.f32.gmra.mrb[6].mxu1 %v312_v35 }
 0x208   :  { %v629_v63 = vpop.f32.mrb[4].mxu0 }
 0x209   :  { %v667_v1 = vpop.f32.mrb[4].mxu1  ;;  %v630_v3 = vpop.f32.mrb[5].mxu0 }
 0x20a   :  { %v631_v4 = vadd.f32 %v630_v3, %v629_v63  ;;  %v668_v5 = vpop.f32.mrb[5].mxu1 }
 0x20b   :  { %v669_v6 = vadd.f32 %v668_v5, %v667_v1 }
 0x20c   :  { %v452_v9 = vadd.f32 %v631_v4, %v596_v2  ;;  %v632_v10 = vpop.f32.mrb[6].mxu0 }
 0x20d   :  { %v670_v0 = vpop.f32.mrb[6].mxu1  ;;  %v633_v11 = vpop.f32.mrb[7].mxu0 }
 0x20e   :  { %v527_v12 = vadd.f32 %v669_v6, %v452_v9  ;;  %v634_v13 = vadd.f32 %v633_v11, %v632_v10  ;;  %v671_v14 = vpop.f32.mrb[7].mxu1 }
 0x20f   :  { %v672_v15 = vadd.f32 %v671_v14, %v670_v0 }
 0x210   :  { %v572_v17 = vmul.f32 1.25, %v527_v12  ;;  %v457_v18 = vadd.f32 %v634_v13, %v596_v2 }
 0x212   :  { %v532_v19 = vadd.f32 %v672_v15, %v457_v18  ;;  %v574_v20 = vsel %vm570_vm0, %v572_v17, 0.0 }
 0x213   :  { %576 = vst [vmem:[#allocation10] sm:$0xff] %v574_v20 }
 0x214   :  { %v573_v21 = vmul.f32 1.25, %v532_v19 }
 0x216   :  { %v575_v22 = vsel %vm571_vm1, %v573_v21, 0.0 }
 0x217   :  { %577 = vst [vmem:[#allocation10 + $0x8] sm:$0xff] %v575_v22 }
 0x218   :  { %887 = shalt.err (!%p884_p0)
}
 0x219   :  { %s888_s18 = scalar_lea.hbm %s1024_s6, 256 }
 0x21a   :  { %p889_p1 = scmp.ne.s32.totalorder %s1024_s6, %s888_s18  ;;  %p892_p2 = scmp.lt.u32.totalorder %s888_s18, %s1024_s6 }
 0x21c   :  { %p894_p3 = pnand %p892_p2, %p889_p1 }
 0x21e   :  { %897 = shalt.err (!%p894_p3)
}
 0x21f   :  { %589 = dma.vmem_to_hbm [thread:$0]  %s584_s14, 256, %s1024_s6, [#allocation6], %s908_s2, %s908_s2, %s909_s21  }
 0x220   :  { %902 = dma.done.wait [#allocation6], 256  }
 0x221   :  { %903 = vsyncadd [#allocation6], 4294967040 }
 0x222   :  { %593 = vsyncpa [#allocation5], 1 }
 0x223   :  { %594 = vsyncpa [#allocation8], 1 }
 0x224   :  { %595 = vsyncpa [#allocation6], 1 }

</bundles_post_ra>
